<compile_context>
chip_gen: v7x
topology: tpu7x:2x2x1
jax: 0.10.0
libtpu: 0.0.40
codegen_flags: <defaults>
</compile_context>

<pallas_src>
import functools
import math

import jax
import jax.numpy as jnp
from jax.experimental import pallas as pl
from jax.experimental.pallas import tpu as pltpu


_VMEM_BUDGET_BYTES = 40 * 1024 * 1024   # safe on v5e/v6e (128 MiB) and v7x (64 MiB)
_MIN_MEGACORE_ROWS = 1024               # below this, a single grid step is fine


def _mylinear_kernel(x_ref, w1_ref, t1_ref, w2_ref, t2_ref, o_ref):
    x = x_ref[...]                                              # f32, loaded once

    # ---- block 1: (Linear ∘ BN) folded -> ReLU (dropout = identity, eval) ----
    y = jnp.dot(x.astype(w1_ref.dtype), w1_ref[...],
                preferred_element_type=jnp.float32)             # bf16 MXU, f32 acc
    y = jnp.maximum(y + t1_ref[...], 0.0)                       # f32 epilogue

    # ---- block 2: (Linear ∘ BN) folded -> ReLU --------------------------------
    y = jnp.dot(y.astype(w2_ref.dtype), w2_ref[...],
                preferred_element_type=jnp.float32)
    y = jnp.maximum(y + t2_ref[...], 0.0)

    # ---- residual --------------------------------------------------------------
    o_ref[...] = (x + y).astype(o_ref.dtype)


def _round_up(x, m):
    return (x + m - 1) // m * m


def _plan_tiling(n, f, requested):
    """Pick the batch tile and a matching VMEM limit.

    Footprint model per batch row (f32 I/O, bf16 MXU operands):
      2 x-pipeline bufs + 2 out-pipeline bufs (f32)      = 16*f bytes
      in-kernel temporaries (x f32, y1/y2 f32, bf16 casts) ~ 24*f bytes
    Weights/shifts are grid-invariant but double-buffered by the pipeline.
    """
    bytes_per_row = 40 * f
    weight_bytes = 2 * (2 * f * f * 2 + 2 * f * 4)              # 2 bufs x (bf16 W + f32 t)

    max_tb = (_VMEM_BUDGET_BYTES - weight_bytes) // bytes_per_row
    max_tb = max(8, (max_tb // 8) * 8)
    tb = min(requested, max_tb)

    # Keep >= 2 grid steps on large batches so dimension_semantics=("parallel",)
    # can shard the grid across both v7x TensorCores.
    if n >= _MIN_MEGACORE_ROWS and tb >= n:
        tb = min(tb, _round_up(pl.cdiv(n, 2), 8))

    # Tiny batch: shrink the tile so we do not allocate oversized buffers.
    tb = max(8, min(tb, _round_up(n, 8)))

    vmem_bytes = min(_VMEM_BUDGET_BYTES,
                     int(tb * bytes_per_row + weight_bytes) + (2 << 20))
    return tb, vmem_bytes


@functools.partial(jax.jit, static_argnames=("tile_b",))
def mylinear_simple(x, w1, t1, w2, t2, *, tile_b=2048):
    """out = x + relu(relu(x @ w1 + t1) @ w2 + t2)  (folded eval-mode module)."""
    n, f = x.shape
    tb, vmem_bytes = _plan_tiling(n, f, tile_b)

    x_spec = pl.BlockSpec((tb, f), lambda i: (i, 0))            # lane-dense streaming tile
    mat_spec = pl.BlockSpec((f, f), lambda i: (0, 0))           # grid-invariant: no re-DMA
    row_spec = pl.BlockSpec((1, f), lambda i: (0, 0))           # folded shift rows

    return pl.pallas_call(
        _mylinear_kernel,
        out_shape=jax.ShapeDtypeStruct((n, f), x.dtype),
        grid_spec=pltpu.PrefetchScalarGridSpec(
            num_scalar_prefetch=0,
            grid=(pl.cdiv(n, tb),),                             # masked edge block if ragged
            in_specs=[x_spec, mat_spec, row_spec, mat_spec, row_spec],
            out_specs=x_spec,
        ),
        compiler_params=pltpu.CompilerParams(
            dimension_semantics=("parallel",),                  # megacore-shardable on v7x
            vmem_limit_bytes=vmem_bytes,
        ),
    )(x, w1, t1, w2, t2)


# ---------------------------------------------------------------------------
# Parameter construction (matches nn.Linear / nn.BatchNorm1d defaults) and
# OFFLINE folding into the kernel's (W', shift') form.
# ---------------------------------------------------------------------------

def _init_module_params(key, f):
    k1, k2, k3, k4 = jax.random.split(key, 4)
    bound = 1.0 / math.sqrt(f)
    # nn.Linear(f, f): weight (f, f), bias (f,).  Stored pre-transposed so the
    # kernel computes x @ W (== PyTorch x @ weight.T).
    w1 = jax.random.uniform(k1, (f, f), jnp.float32, -bound, bound)
    b1 = jax.random.uniform(k2, (1, f), jnp.float32, -bound, bound)
    w2 = jax.random.uniform(k3, (f, f), jnp.float32, -bound, bound)
    b2 = jax.random.uniform(k4, (1, f), jnp.float32, -bound, bound)
    # BatchNorm1d defaults: gamma=1, beta=0, running_mean=0, running_var=1.
    bn = (jnp.ones((1, f), jnp.float32), jnp.zeros((1, f), jnp.float32),
          jnp.zeros((1, f), jnp.float32), jnp.ones((1, f), jnp.float32))
    return w1, b1, w2, b2, bn, bn


def _fold_block(w, b, bn, eps=1e-5, weight_dtype=jnp.bfloat16):
    """Fold Linear(W, b) followed by eval-mode BatchNorm into (W', shift')."""
    gamma, beta, mean, var = bn
    s = gamma / jnp.sqrt(var + eps)
    w_folded = (w * s).astype(weight_dtype)                     # scale output columns
    shift = (b * s + (beta - mean * s)).astype(jnp.float32)
    return w_folded, shift


def fold_params(w1, b1, w2, b2, bn1, bn2, weight_dtype=jnp.bfloat16):
    w1f, t1 = _fold_block(w1, b1, bn1, weight_dtype=weight_dtype)
    w2f, t2 = _fold_block(w2, b2, bn2, weight_dtype=weight_dtype)
    return w1f, t1, w2f, t2


# ---------------------------------------------------------------------------
# References for verification.
# ---------------------------------------------------------------------------

def _reference_module_f32(x, w1, b1, w2, b2, bn1, bn2, eps=1e-5):
    """Eval-mode PyTorch semantics in pure f32."""
    g1, be1, m1, v1 = bn1
    g2, be2, m2, v2 = bn2
    s1 = g1 / jnp.sqrt(v1 + eps); t1 = be1 - m1 * s1
    s2 = g2 / jnp.sqrt(v2 + eps); t2 = be2 - m2 * s2
    y = jnp.maximum((x @ w1 + b1) * s1 + t1, 0.0)
    y = jnp.maximum((y @ w2 + b2) * s2 + t2, 0.0)
    return x + y


def _reference_folded(x, w1, t1, w2, t2):
    """Same numerics as the kernel (bf16-rounded matmul operands, f32 math)."""
    xb = x.astype(w1.dtype).astype(jnp.float32)
    y = jnp.maximum(xb @ w1.astype(jnp.float32) + t1, 0.0)
    yb = y.astype(w2.dtype).astype(jnp.float32)
    y = jnp.maximum(yb @ w2.astype(jnp.float32) + t2, 0.0)
    return x + y


if __name__ == "__main__":
    linear_size = 128
    key = jax.random.PRNGKey(0)
    kx1, kx2, kp = jax.random.split(key, 3)

    raw = _init_module_params(kp, linear_size)
    folded = fold_params(*raw)

    # Case 1: tiny batch — tile collapses to 16 rows, single grid step.
    x_small = jax.random.normal(kx1, (16, linear_size), jnp.float32)
    out_small = jax.block_until_ready(mylinear_simple(x_small, *folded))
    assert out_small.shape == x_small.shape
    assert jnp.allclose(out_small, _reference_folded(x_small, *folded),
                        atol=2e-3, rtol=2e-3)
    assert jnp.allclose(out_small, _reference_module_f32(x_small, *raw),
                        atol=5e-2, rtol=5e-2)

    # Case 2: ragged batch exercising the cdiv grid with a masked edge block
    # (3 steps of 128 rows; last block has only 44 valid rows, no padding).
    x_ragged = jax.random.normal(kx2, (300, linear_size), jnp.float32)
    out_ragged = jax.block_until_ready(
        mylinear_simple(x_ragged, *folded, tile_b=128))
    assert out_ragged.shape == x_ragged.shape
    assert jnp.allclose(out_ragged, _reference_folded(x_ragged, *folded),
                        atol=2e-3, rtol=2e-3)
    assert jnp.allclose(out_ragged, _reference_module_f32(x_ragged, *raw),
                        atol=5e-2, rtol=5e-2)

    print("KERNEL_OK")
</pallas_src>

<mosaic_0001>
module attributes {stable_mosaic.version = 11 : i64} {
  func.func @_mylinear_kernel(%arg0: i32, %arg1: memref<16x128xf32, #tpu.memory_space<vmem>>, %arg2: memref<128x128xbf16, #tpu.memory_space<vmem>>, %arg3: memref<1x128xf32, #tpu.memory_space<vmem>>, %arg4: memref<128x128xbf16, #tpu.memory_space<vmem>>, %arg5: memref<1x128xf32, #tpu.memory_space<vmem>>, %arg6: memref<16x128xf32, #tpu.memory_space<vmem>>) attributes {dimension_semantics = [#tpu.dimension_semantics<parallel>], iteration_bounds = array<i64: 1>, scalar_prefetch = 0 : i64, scratch_operands = 0 : i64, tpu.core_type = #tpu.core_type<tc>, window_params = [{transform_indices = @transform_0, window_bounds = array<i64: 16, 128>}, {pipeline_mode = #tpu.pipeline_mode<synchronous>, transform_indices = @transform_1, window_bounds = array<i64: 128, 128>}, {pipeline_mode = #tpu.pipeline_mode<synchronous>, transform_indices = @transform_2, window_bounds = array<i64: 1, 128>}, {pipeline_mode = #tpu.pipeline_mode<synchronous>, transform_indices = @transform_3, window_bounds = array<i64: 128, 128>}, {pipeline_mode = #tpu.pipeline_mode<synchronous>, transform_indices = @transform_4, window_bounds = array<i64: 1, 128>}, {transform_indices = @transform_5, window_bounds = array<i64: 16, 128>}]} {
    %c0 = arith.constant 0 : index
    %c0_0 = arith.constant 0 : index
    %0 = vector.load %arg1[%c0, %c0_0] : memref<16x128xf32, #tpu.memory_space<vmem>>, vector<16x128xf32>
    %1 = arith.truncf %0 : vector<16x128xf32> to vector<16x128xbf16>
    %c0_1 = arith.constant 0 : index
    %c0_2 = arith.constant 0 : index
    %2 = vector.load %arg2[%c0_1, %c0_2] : memref<128x128xbf16, #tpu.memory_space<vmem>>, vector<128x128xbf16>
    %cst = arith.constant dense<0.000000e+00> : vector<16x128xf32>
    %3 = tpu.matmul %1, %2, %cst {dimension_numbers = #tpu.dot_dimension_numbers<[1], [0], [0], [1], [0, 0, 1, 1], [], []>} : vector<16x128xbf16>, vector<128x128xbf16>, vector<16x128xf32> -> vector<16x128xf32>
    %c0_3 = arith.constant 0 : index
    %c0_4 = arith.constant 0 : index
    %4 = vector.load %arg3[%c0_3, %c0_4] : memref<1x128xf32, #tpu.memory_space<vmem>>, vector<1x128xf32>
    %5 = vector.broadcast %4 : vector<1x128xf32> to vector<16x128xf32>
    %6 = arith.addf %3, %5 : vector<16x128xf32>
    %cst_5 = arith.constant 0.000000e+00 : f32
    %7 = vector.broadcast %cst_5 : f32 to vector<16x128xf32>
    %8 = arith.maximumf %6, %7 : vector<16x128xf32>
    %9 = arith.truncf %8 : vector<16x128xf32> to vector<16x128xbf16>
    %c0_6 = arith.constant 0 : index
    %c0_7 = arith.constant 0 : index
    %10 = vector.load %arg4[%c0_6, %c0_7] : memref<128x128xbf16, #tpu.memory_space<vmem>>, vector<128x128xbf16>
    %cst_8 = arith.constant dense<0.000000e+00> : vector<16x128xf32>
    %11 = tpu.matmul %9, %10, %cst_8 {dimension_numbers = #tpu.dot_dimension_numbers<[1], [0], [0], [1], [0, 0, 1, 1], [], []>} : vector<16x128xbf16>, vector<128x128xbf16>, vector<16x128xf32> -> vector<16x128xf32>
    %c0_9 = arith.constant 0 : index
    %c0_10 = arith.constant 0 : index
    %12 = vector.load %arg5[%c0_9, %c0_10] : memref<1x128xf32, #tpu.memory_space<vmem>>, vector<1x128xf32>
    %13 = vector.broadcast %12 : vector<1x128xf32> to vector<16x128xf32>
    %14 = arith.addf %11, %13 : vector<16x128xf32>
    %cst_11 = arith.constant 0.000000e+00 : f32
    %15 = vector.broadcast %cst_11 : f32 to vector<16x128xf32>
    %16 = arith.maximumf %14, %15 : vector<16x128xf32>
    %17 = arith.addf %0, %16 : vector<16x128xf32>
    %c0_12 = arith.constant 0 : index
    %c0_13 = arith.constant 0 : index
    %18 = vector.load %arg6[%c0_12, %c0_13] : memref<16x128xf32, #tpu.memory_space<vmem>>, vector<16x128xf32>
    tpu.vector_store %arg6[%c0_12, %c0_13], %17 {strides = array<i32>} : memref<16x128xf32, #tpu.memory_space<vmem>>, vector<16x128xf32>,
    return
  }
  func.func @transform_0(%arg0: i32) -> (i32, i32) {
    %c0_i32 = arith.constant 0 : i32
    %c0_i32_0 = arith.constant 0 : i32
    return %arg0, %c0_i32 : i32, i32
  }
  func.func @transform_1(%arg0: i32) -> (i32, i32) {
    %c0_i32 = arith.constant 0 : i32
    %c0_i32_0 = arith.constant 0 : i32
    %c0_i32_1 = arith.constant 0 : i32
    return %c0_i32, %c0_i32_0 : i32, i32
  }
  func.func @transform_2(%arg0: i32) -> (i32, i32) {
    %c0_i32 = arith.constant 0 : i32
    %c0_i32_0 = arith.constant 0 : i32
    %c0_i32_1 = arith.constant 0 : i32
    return %c0_i32, %c0_i32_0 : i32, i32
  }
  func.func @transform_3(%arg0: i32) -> (i32, i32) {
    %c0_i32 = arith.constant 0 : i32
    %c0_i32_0 = arith.constant 0 : i32
    %c0_i32_1 = arith.constant 0 : i32
    return %c0_i32, %c0_i32_0 : i32, i32
  }
  func.func @transform_4(%arg0: i32) -> (i32, i32) {
    %c0_i32 = arith.constant 0 : i32
    %c0_i32_0 = arith.constant 0 : i32
    %c0_i32_1 = arith.constant 0 : i32
    return %c0_i32, %c0_i32_0 : i32, i32
  }
  func.func @transform_5(%arg0: i32) -> (i32, i32) {
    %c0_i32 = arith.constant 0 : i32
    %c0_i32_0 = arith.constant 0 : i32
    return %arg0, %c0_i32 : i32, i32
  }
}

</mosaic_0001>

<bundles_post_ra>
// kernel: mylinear_simple.1
= control target key start
LH: loop header
LB: loop body
LE: loop exit
PB: predicated region body
PF: predicated region fallthrough
CT: control target
= control target key end

     0   :  { %10 = vsyncpa [#allocation3], 0  ;;  %s619_s0 = inlined_call_operand.hbm [shape: f32[16,128], index: 0, kind: input, shape index: {}]   ;;  %s620_s1 = inlined_call_operand.hbm [shape: bf16[128,128], index: 1, kind: input, shape index: {}]   ;;  %s621_s2 = inlined_call_operand.vmem [shape: f32[1,128], index: 2, kind: input, shape index: {}]   ;;  %s622_s3 = inlined_call_operand.hbm [shape: bf16[128,128], index: 3, kind: input, shape index: {}]   ;;  %s623_s4 = inlined_call_operand.vmem [shape: f32[1,128], index: 4, kind: input, shape index: {}]   ;;  %s624_s5 = inlined_call_operand.hbm [shape: f32[16,128], index: 5, kind: output, shape index: {}]  }
   0x1   :  { %11 = vsyncpa [#allocation6], 0 }
   0x2   :  { %12 = vsyncpa [#allocation4], 0  ;;  %s513_s18 = smov [#allocation5]   ;;  %s419_s22 = scalar_lea.hbm %s620_s1, 1024 }
   0x3   :  { %s30_s19 = sshll.u32 %s513_s18, 4  ;;  %p420_p0 = scmp.ne.s32.totalorder %s620_s1, %s419_s22  ;;  %s31_s19 = int_to_ptr.vmem [resolvable:$true] %s30_s19 }
   0x4   :  { %p423_p1 = scmp.lt.u32.totalorder %s419_s22, %s620_s1 }
   0x6   :  { %p425_p2 = pnand %p423_p1, %p420_p0 }
   0x8   :  { %428 = shalt.err (!%p425_p2)
}
   0x9   :  { %s429_s27 = scalar_lea.vmem %s31_s19, 1024  ;;  %p434_p4 = scmp.lt.s32.totalorder %s31_s19, %s31_s19 }
   0xa   :  { %p430_p3 = scmp.ne.s32.totalorder %s31_s19, %s429_s27  ;;  %p435_p5 = scmp.lt.s32.totalorder %s429_s27, %s429_s27 }
   0xc   :  { %p436_p6 = por %p435_p5, %p434_p4 }
   0xe   :  { %p437_p7 = pnand %p436_p6, %p430_p3 }
  0x10   :  { %440 = shalt.err (!%p437_p7)
}
  0x11   :  { %s514_s28 = smov 64   ;;  %s515_s29 = smov 4  }
  0x12   :  { %36 = dma.hbm_to_vmem [thread:$0]  %s620_s1, 1024, %s31_s19, [#allocation6], %s514_s28, %s514_s28, %s515_s29  }
  0x13   :  { %s516_s7 = smov [#allocation2]   ;;  %s441_s11 = scalar_lea.hbm %s619_s0, 256 }
  0x14   :  { %s18_s8 = sshll.u32 %s516_s7, 4  ;;  %p442_p8 = scmp.ne.s32.totalorder %s619_s0, %s441_s11  ;;  %s19_s8 = int_to_ptr.vmem [resolvable:$true] %s18_s8 }
  0x15   :  { %p445_p9 = scmp.lt.u32.totalorder %s441_s11, %s619_s0 }
  0x17   :  { %p447_p10 = pnand %p445_p9, %p442_p8 }
  0x19   :  { %450 = shalt.err (!%p447_p10)
}
  0x1a   :  { %s451_s16 = scalar_lea.vmem %s19_s8, 256  ;;  %p456_p12 = scmp.lt.s32.totalorder %s19_s8, %s19_s8 }
  0x1b   :  { %p452_p11 = scmp.ne.s32.totalorder %s19_s8, %s451_s16  ;;  %p457_p13 = scmp.lt.s32.totalorder %s451_s16, %s451_s16 }
  0x1d   :  { %p458_p0 = por %p457_p13, %p456_p12 }
  0x1f   :  { %p459_p1 = pnand %p458_p0, %p452_p11 }
  0x21   :  { %462 = shalt.err (!%p459_p1)
}
  0x22   :  { %s517_s1 = smov 128   ;;  %s518_s17 = smov 8  }
  0x23   :  { %24 = dma.hbm_to_vmem [thread:$0]  %s619_s0, 256, %s19_s8, [#allocation3], %s517_s1, %s517_s1, %s518_s17  }
  0x24   :  { %s519_s20 = smov [#allocation7]   ;;  %s463_s24 = scalar_lea.hbm %s622_s3, 1024 }
  0x25   :  { %s44_s21 = sshll.u32 %s519_s20, 4  ;;  %p464_p2 = scmp.ne.s32.totalorder %s622_s3, %s463_s24  ;;  %s45_s21 = int_to_ptr.vmem [resolvable:$true] %s44_s21 }
  0x26   :  { %p467_p3 = scmp.lt.u32.totalorder %s463_s24, %s622_s3 }
  0x28   :  { %p469_p4 = pnand %p467_p3, %p464_p2 }
  0x2a   :  { %472 = shalt.err (!%p469_p4)
}
  0x2b   :  { %s473_s6 = scalar_lea.vmem %s45_s21, 1024  ;;  %p478_p6 = scmp.lt.s32.totalorder %s45_s21, %s45_s21 }
  0x2c   :  { %p474_p5 = scmp.ne.s32.totalorder %s45_s21, %s473_s6  ;;  %p479_p7 = scmp.lt.s32.totalorder %s473_s6, %s473_s6 }
  0x2e   :  { %p480_p8 = por %p479_p7, %p478_p6 }
  0x30   :  { %p481_p9 = pnand %p480_p8, %p474_p5 }
  0x32   :  { %484 = shalt.err (!%p481_p9)
}
  0x33   :  { %50 = dma.hbm_to_vmem [thread:$0]  %s622_s3, 1024, %s45_s21, [#allocation6], %s514_s28, %s514_s28, %s515_s29  }
  0x34   :  { %507 = dma.done.wait [#allocation3], 256  }
  0x35   :  { %508 = vsyncadd [#allocation3], 4294967040 }
  0x36   :  { %509 = dma.done.wait [#allocation6], 2048  }
  0x37   :  { %510 = vsyncadd [#allocation6], 4294965248  ;;  %v520_v0 = vmov 0.0   ;;  %vm521_vm0 = vmmov 0   ;;  %v403_v1 = vld [vmem:[#allocation5] sm:$0xff]   ;;  %v404_v2 = vld [vmem:[#allocation5 + $0x8] sm:$0xff]  }
  0x38   :  { %353 = vmatprep.subr.bf16.mxu0 %v520_v0  ;;  %369 = vmatprep.mubr.msk.bf16.mxu0 %vm521_vm0, %v520_v0  ;;  %v405_v3 = vld [vmem:[#allocation5 + $0x10] sm:$0xff]   ;;  %v411_v4 = vld [vmem:[#allocation7] sm:$0xff]   ;;  %v406_v5 = vld [vmem:[#allocation5 + $0x18] sm:$0xff]  }
  0x39   :  { %373 = vmatprep.subr.bf16.mxu1 %v520_v0  ;;  %389 = vmatprep.mubr.msk.bf16.mxu1 %vm521_vm0, %v520_v0  ;;  %v412_v6 = vld [vmem:[#allocation7 + $0x8] sm:$0xff]   ;;  %v407_v7 = vld [vmem:[#allocation5 + $0x20] sm:$0xff]   ;;  %v413_v8 = vld [vmem:[#allocation7 + $0x10] sm:$0xff]  }
  0x3a   :  { %354 = vmatpush3.bf16.msra.mxu0 %v403_v1  ;;  %374 = vmatpush3.bf16.msra.mxu1 %v411_v4  ;;  %v408_v9 = vld [vmem:[#allocation5 + $0x28] sm:$0xff]   ;;  %v414_v10 = vld [vmem:[#allocation7 + $0x18] sm:$0xff]   ;;  %v409_v11 = vld [vmem:[#allocation5 + $0x30] sm:$0xff]  }
  0x3b   :  { %355 = vmatprep.subr.bf16.mxu0 %v520_v0  ;;  %375 = vmatprep.subr.bf16.mxu1 %v520_v0  ;;  %v415_v12 = vld [vmem:[#allocation7 + $0x20] sm:$0xff]   ;;  %v410_v13 = vld [vmem:[#allocation5 + $0x38] sm:$0xff]   ;;  %v63_v14 = vld [vmem:[#allocation2] sm:$0xff] }
  0x3c   :  { %v64_v15 = vld [vmem:[#allocation2 + $0x8] sm:$0xff]  ;;  %v416_v16 = vld [vmem:[#allocation7 + $0x28] sm:$0xff]   ;;  %v417_v18 = vld [vmem:[#allocation7 + $0x30] sm:$0xff]  }
  0x3d   :  { %v65_v17 = vpack.c.bf16 %v64_v15, %v63_v14  ;;  %v418_v19 = vld [vmem:[#allocation7 + $0x38] sm:$0xff]   ;;  %v317_v20 = vld [vmem:[%s621_s2] ss:$0 sm:$0xff]  ;;  %s522_s2 = smov [#allocation8]  }
  0x3e   :  { %356 = vmatpush3.bf16.msra.mxu0 %v404_v2  ;;  %376 = vmatpush3.bf16.msra.mxu1 %v412_v6  ;;  %v326_v30 = vld [vmem:[%s623_s4] ss:$0 sm:$0xff]  ;;  %s304_s9 = sshll.u32 %s522_s2, 4  ;;  %s305_s9 = int_to_ptr.vmem [resolvable:$true] %s304_s9 }
  0x3f   :  { %357 = vmatprep.subr.bf16.mxu0 %v520_v0  ;;  %377 = vmatprep.subr.bf16.mxu1 %v520_v0  ;;  %s485_s10 = scalar_lea.vmem %s305_s9, 256  ;;  %p490_p11 = scmp.lt.s32.totalorder %s305_s9, %s305_s9 }
  0x40   :  { %p486_p10 = scmp.ne.s32.totalorder %s305_s9, %s485_s10  ;;  %p491_p12 = scmp.lt.s32.totalorder %s485_s10, %s485_s10 }
  0x42   :  { %358 = vmatpush3.bf16.msra.mxu0 %v405_v3  ;;  %378 = vmatpush3.bf16.msra.mxu1 %v413_v8  ;;  %p492_p13 = por %p491_p12, %p490_p11 }
  0x43   :  { %359 = vmatprep.subr.bf16.mxu0 %v520_v0  ;;  %379 = vmatprep.subr.bf16.mxu1 %v520_v0 }
  0x44   :  { %p493_p0 = pnand %p492_p13, %p486_p10 }
  0x46   :  { %360 = vmatpush3.bf16.msra.mxu0 %v406_v5  ;;  %380 = vmatpush3.bf16.msra.mxu1 %v414_v10 }
  0x47   :  { %361 = vmatprep.subr.bf16.mxu0 %v520_v0  ;;  %381 = vmatprep.subr.bf16.mxu1 %v520_v0 }
  0x4a   :  { %362 = vmatpush3.bf16.msra.mxu0 %v407_v7  ;;  %382 = vmatpush3.bf16.msra.mxu1 %v415_v12 }
  0x4b   :  { %363 = vmatprep.subr.bf16.mxu0 %v520_v0  ;;  %383 = vmatprep.subr.bf16.mxu1 %v520_v0 }
  0x4e   :  { %364 = vmatpush3.bf16.msra.mxu0 %v408_v9  ;;  %384 = vmatpush3.bf16.msra.mxu1 %v416_v16 }
  0x4f   :  { %365 = vmatprep.subr.bf16.mxu0 %v520_v0  ;;  %385 = vmatprep.subr.bf16.mxu1 %v520_v0 }
  0x52   :  { %366 = vmatpush3.bf16.msra.mxu0 %v409_v11  ;;  %386 = vmatpush3.bf16.msra.mxu1 %v417_v18 }
  0x53   :  { %367 = vmatprep.subr.bf16.mxu0 %v520_v0  ;;  %387 = vmatprep.subr.bf16.mxu1 %v520_v0 }
  0x56   :  { %368 = vmatpush3.bf16.msra.mxu0 %v410_v13  ;;  %388 = vmatpush3.bf16.msra.mxu1 %v418_v19 }
  0x59   :  { %370 = vmatmul.mubr.bf16.vlgmr.msra.gmra.mrb[0].mxu0 %v65_v17 }
 0x12c   :  { %v171_v21 = vpop.f32.mrb[0].mxu0 }
 0x12d   :  { %v172_v22 = vadd.f32 %v317_v20, %v171_v21  ;;  %v371_v23 = vpop.f32.mrb[1].mxu0 }
 0x12e   :  { %v174_v24 = vpop.f32.mrb[2].mxu0 }
 0x12f   :  { %v175_v25 = vadd.f32 %v317_v20, %v174_v24  ;;  %v372_v26 = vpop.f32.mrb[3].mxu0  ;;  %v178_v27 = vmax.f32 %v172_v22, 0.0 }
 0x131   :  { %v179_v28 = vmax.f32 %v175_v25, 0.0 }
 0x133   :  { %v180_v29 = vpack.c.bf16 %v179_v28, %v178_v27 }
 0x135   :  { %390 = vmatmul.mubr.bf16.vlgmr.msra.gmra.mrb[0].mxu1 %v180_v29 }
 0x208   :  { %v286_v31 = vpop.f32.mrb[0].mxu1 }
 0x209   :  { %v287_v32 = vadd.f32 %v326_v30, %v286_v31  ;;  %v391_v33 = vpop.f32.mrb[1].mxu1 }
 0x20a   :  { %v289_v34 = vpop.f32.mrb[2].mxu1 }
 0x20b   :  { %v293_v35 = vmax.f32 %v287_v32, 0.0  ;;  %v290_v36 = vadd.f32 %v326_v30, %v289_v34  ;;  %v392_v37 = vpop.f32.mrb[3].mxu1 }
 0x20d   :  { %v295_v38 = vadd.f32 %v293_v35, %v63_v14  ;;  %v294_v39 = vmax.f32 %v290_v36, 0.0 }
 0x20f   :  { %297 = vst [vmem:[#allocation8] sm:$0xff] %v295_v38  ;;  %v296_v40 = vadd.f32 %v294_v39, %v64_v15 }
 0x211   :  { %298 = vst [vmem:[#allocation8 + $0x8] sm:$0xff] %v296_v40 }
 0x212   :  { %496 = shalt.err (!%p493_p0)
}
 0x213   :  { %s497_s12 = scalar_lea.hbm %s624_s5, 256 }
 0x214   :  { %p498_p1 = scmp.ne.s32.totalorder %s624_s5, %s497_s12  ;;  %p501_p2 = scmp.lt.u32.totalorder %s497_s12, %s624_s5 }
 0x216   :  { %p503_p3 = pnand %p501_p2, %p498_p1 }
 0x218   :  { %506 = shalt.err (!%p503_p3)
}
 0x219   :  { %310 = dma.vmem_to_hbm [thread:$0]  %s305_s9, 256, %s624_s5, [#allocation4], %s517_s1, %s517_s1, %s518_s17  }
 0x21a   :  { %511 = dma.done.wait [#allocation4], 256  }
 0x21b   :  { %512 = vsyncadd [#allocation4], 4294967040 }
 0x21c   :  { %314 = vsyncpa [#allocation3], 1 }
 0x21d   :  { %315 = vsyncpa [#allocation6], 1 }
 0x21e   :  { %316 = vsyncpa [#allocation4], 1 }

</bundles_post_ra>
